<compile_context>
chip_gen: v6e
topology: v6e:2x2x1
jax: 0.10.0
libtpu: 0.0.40
codegen_flags: <defaults>
</compile_context>

<pallas_src>
import functools

import jax
import jax.numpy as jnp
import numpy as np
from jax.experimental import pallas as pl
from jax.experimental.pallas import tpu as pltpu


def _adapter_kernel(h_ref, s_ref, wg_ref, wd_ref, b_ref, wu_ref, o_ref, *, dim):
    """One row-tile: gate/down matmuls, SiLU(g)*d product, up matmul."""
    h = h_ref[...]
    s = s_ref[...]

    # gate pre-activation: [h | s] @ W_gate + b  (concat never materialized;
    # the h-/s-halves of W_gate are free static sublane slices of the ref).
    g = (jnp.dot(h, wg_ref[:dim, :], preferred_element_type=jnp.float32)
         + jnp.dot(s, wg_ref[dim:, :], preferred_element_type=jnp.float32)
         + b_ref[...].astype(jnp.float32))

    # down projection: [h | s] @ W_down
    d = (jnp.dot(h, wd_ref[:dim, :], preferred_element_type=jnp.float32)
         + jnp.dot(s, wd_ref[dim:, :], preferred_element_type=jnp.float32))

    # SiLU(g) * d in f32 (sigmoid -> EUP slot, muls -> VPU).
    mid = (g * jax.nn.sigmoid(g)) * d

    # Up projection back to dim; feed the MXU in the weight's native dtype.
    out = jnp.dot(mid.astype(wu_ref.dtype), wu_ref[...],
                  preferred_element_type=jnp.float32)
    o_ref[...] = out.astype(o_ref.dtype)


def _vmem_capacity_bytes():
    """Per-core VMEM capacity; conservative fallback if the query fails."""
    try:
        return int(pltpu.get_tpu_info().vmem_capacity_bytes)
    except Exception:
        return 64 * 1024 * 1024  # v7x per-TC VMEM (smallest current generation)


def _pick_row_tile(M, dim, rank, act_bytes, w_bytes, tm_req):
    """VMEM-aware row-tile selection + vmem_limit_bytes for CompilerParams."""
    sub = 16 if act_bytes < 4 else 8          # sublane packing of the act dtype
    cap = _vmem_capacity_bytes()
    budget = int(cap * 0.75)                  # headroom for compiler scratch

    def vmem_need(tm):
        act_io = 2 * (2 * tm * dim * act_bytes)            # h, s tiles, 2 buffers
        out_io = 2 * (tm * dim * act_bytes)                 # out tile, 2 buffers
        weights = (4 * dim * rank + rank * dim) * w_bytes + rank * 4  # 1 buffer
        interm = tm * 3 * rank * 4                          # f32 g/d/mid spill
        return act_io + out_io + weights + interm

    def round_sub(t):
        return max(sub, (t // sub) * sub)

    tm = round_sub(min(tm_req, pl.cdiv(M, sub) * sub))
    while tm > sub and vmem_need(tm) > budget:
        tm = round_sub(tm // 2)
    # Give megacore parts (2 TensorCores) at least two row tiles to shard.
    while tm > sub and pl.cdiv(M, tm) < 2:
        tm = round_sub(tm // 2)

    vmem_limit = min(int(cap * 0.9),
                     max(2 * vmem_need(tm) + (8 << 20), 32 << 20))
    return tm, int(vmem_limit)


def _const_spec(block_shape):
    """Whole-array spec with a constant index map, single-buffered when the
    installed JAX supports per-operand pipeline_mode (constant operands gain
    nothing from double buffering; this halves their VMEM footprint)."""
    index_map = lambda i: (0,) * len(block_shape)
    try:
        return pl.BlockSpec(block_shape, index_map, pipeline_mode=pl.Buffered(1))
    except TypeError:  # older JAX without pipeline_mode on BlockSpec
        return pl.BlockSpec(block_shape, index_map)


def low_rank_adapter(h, s, w_gate, b_gate, w_down, w_up, *, tm=512):
    """h, s: (..., dim). Weights stored (in_features, out_features):
       w_gate, w_down: (2*dim, rank); b_gate: (rank,); w_up: (rank, dim).
       Returns (..., dim) in h.dtype."""
    dim = h.shape[-1]
    rank = w_gate.shape[1]
    batch_shape = h.shape[:-1]
    M = int(np.prod(batch_shape)) if batch_shape else 1

    h2 = h.reshape(M, dim)
    s2 = s.reshape(M, dim)
    b2 = b_gate.reshape(1, rank)

    act_bytes = h.dtype.itemsize
    w_bytes = w_up.dtype.itemsize
    tm_eff, vmem_limit = _pick_row_tile(M, dim, rank, act_bytes, w_bytes, tm)
    grid = (pl.cdiv(M, tm_eff),)   # no pre-padding: Pallas handles the ragged tail

    row_map = lambda i: (i, 0)

    cost = pl.CostEstimate(
        flops=10 * M * dim * rank,                 # gate + down + up matmuls
        transcendentals=M * rank,                  # sigmoid
        bytes_accessed=3 * M * dim * act_bytes
        + (4 * dim * rank + rank * dim) * w_bytes + rank * 4,
    )

    out = pl.pallas_call(
        functools.partial(_adapter_kernel, dim=dim),
        out_shape=jax.ShapeDtypeStruct((M, dim), h.dtype),
        grid_spec=pltpu.PrefetchScalarGridSpec(
            num_scalar_prefetch=0,
            grid=grid,
            in_specs=[
                pl.BlockSpec((tm_eff, dim), row_map),   # h rows (double-buffered)
                pl.BlockSpec((tm_eff, dim), row_map),   # s rows (double-buffered)
                _const_spec((2 * dim, rank)),           # W_gate (VMEM-resident)
                _const_spec((2 * dim, rank)),           # W_down (VMEM-resident)
                _const_spec((1, rank)),                 # gate bias
                _const_spec((rank, dim)),               # W_up   (VMEM-resident)
            ],
            out_specs=pl.BlockSpec((tm_eff, dim), row_map),
        ),
        compiler_params=pltpu.CompilerParams(
            dimension_semantics=("parallel",),
            vmem_limit_bytes=vmem_limit,
        ),
        cost_estimate=cost,
    )(h2, s2, w_gate, w_down, b2, w_up)

    return out.reshape(*batch_shape, dim)


def _reference(h, s, w_gate, b_gate, w_down, w_up):
    x = jnp.concatenate([h, s], axis=-1)
    g = x @ w_gate + b_gate
    d = x @ w_down
    return (jax.nn.silu(g) * d) @ w_up


if __name__ == "__main__":
    # Small, deterministic shapes consistent with the module's forward.
    batch, seq, dim, rank = 2, 8, 32, 64

    key = jax.random.PRNGKey(0)
    kh, ks, kg, kbg, kd, ku = jax.random.split(key, 6)

    h = jax.random.normal(kh, (batch, seq, dim), dtype=jnp.float32)
    s = jax.random.normal(ks, (batch, seq, dim), dtype=jnp.float32)

    # Deterministic parameter init (shapes from __init__; stored as (in, out)).
    w_gate = jax.random.normal(kg, (2 * dim, rank), dtype=jnp.float32) * 0.05
    b_gate = jax.random.normal(kbg, (rank,), dtype=jnp.float32) * 0.05
    w_down = jax.random.normal(kd, (2 * dim, rank), dtype=jnp.float32) * 0.05
    w_up = jax.random.normal(ku, (rank, dim), dtype=jnp.float32) * 0.05

    out = jax.block_until_ready(low_rank_adapter(h, s, w_gate, b_gate, w_down, w_up))
    ref = _reference(h, s, w_gate, b_gate, w_down, w_up)
    np.testing.assert_allclose(np.asarray(out), np.asarray(ref),
                               rtol=1e-5, atol=1e-5)

    # Ragged row count: exercises the Pallas partial last tile (no pre-padding).
    h_r = h[:, :5, :]
    s_r = s[:, :5, :]
    out_r = jax.block_until_ready(low_rank_adapter(h_r, s_r, w_gate, b_gate, w_down, w_up))
    ref_r = _reference(h_r, s_r, w_gate, b_gate, w_down, w_up)
    np.testing.assert_allclose(np.asarray(out_r), np.asarray(ref_r),
                               rtol=1e-5, atol=1e-5)

    print("KERNEL_OK")
</pallas_src>

<mosaic_0001>
module attributes {stable_mosaic.version = 11 : i64} {
  func.func @_adapter_kernel(%arg0: i32, %arg1: memref<8x32xf32, #tpu.memory_space<vmem>>, %arg2: memref<8x32xf32, #tpu.memory_space<vmem>>, %arg3: memref<64x64xf32, #tpu.memory_space<vmem>>, %arg4: memref<64x64xf32, #tpu.memory_space<vmem>>, %arg5: memref<1x64xf32, #tpu.memory_space<vmem>>, %arg6: memref<64x32xf32, #tpu.memory_space<vmem>>, %arg7: memref<8x32xf32, #tpu.memory_space<vmem>>) attributes {dimension_semantics = [#tpu.dimension_semantics<parallel>], iteration_bounds = array<i64: 2>, scalar_prefetch = 0 : i64, scratch_operands = 0 : i64, tpu.core_type = #tpu.core_type<tc>, window_params = [{transform_indices = @transform_0, window_bounds = array<i64: 8, 32>}, {transform_indices = @transform_1, window_bounds = array<i64: 8, 32>}, {pipeline_mode = #tpu.pipeline_mode<synchronous>, transform_indices = @transform_2, window_bounds = array<i64: 64, 64>}, {pipeline_mode = #tpu.pipeline_mode<synchronous>, transform_indices = @transform_3, window_bounds = array<i64: 64, 64>}, {pipeline_mode = #tpu.pipeline_mode<synchronous>, transform_indices = @transform_4, window_bounds = array<i64: 1, 64>}, {pipeline_mode = #tpu.pipeline_mode<synchronous>, transform_indices = @transform_5, window_bounds = array<i64: 64, 32>}, {transform_indices = @transform_6, window_bounds = array<i64: 8, 32>}]} {
    %c0 = arith.constant 0 : index
    %c0_0 = arith.constant 0 : index
    %0 = vector.load %arg1[%c0, %c0_0] : memref<8x32xf32, #tpu.memory_space<vmem>>, vector<8x32xf32>
    %c0_1 = arith.constant 0 : index
    %c0_2 = arith.constant 0 : index
    %1 = vector.load %arg2[%c0_1, %c0_2] : memref<8x32xf32, #tpu.memory_space<vmem>>, vector<8x32xf32>
    %c0_3 = arith.constant 0 : index
    %c0_4 = arith.constant 0 : index
    %2 = vector.load %arg3[%c0_3, %c0_4] : memref<64x64xf32, #tpu.memory_space<vmem>>, vector<32x64xf32>
    %cst = arith.constant dense<0.000000e+00> : vector<8x64xf32>
    %3 = tpu.matmul %0, %2, %cst {dimension_numbers = #tpu.dot_dimension_numbers<[1], [0], [0], [1], [0, 0, 1, 1], [], []>} : vector<8x32xf32>, vector<32x64xf32>, vector<8x64xf32> -> vector<8x64xf32>
    %c32 = arith.constant 32 : index
    %c0_5 = arith.constant 0 : index
    %4 = vector.load %arg3[%c32, %c0_5] : memref<64x64xf32, #tpu.memory_space<vmem>>, vector<32x64xf32>
    %cst_6 = arith.constant dense<0.000000e+00> : vector<8x64xf32>
    %5 = tpu.matmul %1, %4, %cst_6 {dimension_numbers = #tpu.dot_dimension_numbers<[1], [0], [0], [1], [0, 0, 1, 1], [], []>} : vector<8x32xf32>, vector<32x64xf32>, vector<8x64xf32> -> vector<8x64xf32>
    %6 = arith.addf %3, %5 : vector<8x64xf32>
    %c0_7 = arith.constant 0 : index
    %c0_8 = arith.constant 0 : index
    %7 = vector.load %arg5[%c0_7, %c0_8] : memref<1x64xf32, #tpu.memory_space<vmem>>, vector<1x64xf32>
    %8 = vector.broadcast %7 : vector<1x64xf32> to vector<8x64xf32>
    %9 = arith.addf %6, %8 : vector<8x64xf32>
    %c0_9 = arith.constant 0 : index
    %c0_10 = arith.constant 0 : index
    %10 = vector.load %arg4[%c0_9, %c0_10] : memref<64x64xf32, #tpu.memory_space<vmem>>, vector<32x64xf32>
    %cst_11 = arith.constant dense<0.000000e+00> : vector<8x64xf32>
    %11 = tpu.matmul %0, %10, %cst_11 {dimension_numbers = #tpu.dot_dimension_numbers<[1], [0], [0], [1], [0, 0, 1, 1], [], []>} : vector<8x32xf32>, vector<32x64xf32>, vector<8x64xf32> -> vector<8x64xf32>
    %c32_12 = arith.constant 32 : index
    %c0_13 = arith.constant 0 : index
    %12 = vector.load %arg4[%c32_12, %c0_13] : memref<64x64xf32, #tpu.memory_space<vmem>>, vector<32x64xf32>
    %cst_14 = arith.constant dense<0.000000e+00> : vector<8x64xf32>
    %13 = tpu.matmul %1, %12, %cst_14 {dimension_numbers = #tpu.dot_dimension_numbers<[1], [0], [0], [1], [0, 0, 1, 1], [], []>} : vector<8x32xf32>, vector<32x64xf32>, vector<8x64xf32> -> vector<8x64xf32>
    %14 = arith.addf %11, %13 : vector<8x64xf32>
    %15 = arith.negf %9 : vector<8x64xf32>
    %16 = math.exp %15 : vector<8x64xf32>
    %cst_15 = arith.constant 1.000000e+00 : f32
    %17 = vector.broadcast %cst_15 : f32 to vector<8x64xf32>
    %18 = arith.addf %17, %16 : vector<8x64xf32>
    %19 = arith.divf %17, %18 : vector<8x64xf32>
    %20 = arith.mulf %9, %19 : vector<8x64xf32>
    %21 = arith.mulf %20, %14 : vector<8x64xf32>
    %c0_16 = arith.constant 0 : index
    %c0_17 = arith.constant 0 : index
    %22 = vector.load %arg6[%c0_16, %c0_17] : memref<64x32xf32, #tpu.memory_space<vmem>>, vector<64x32xf32>
    %cst_18 = arith.constant dense<0.000000e+00> : vector<8x32xf32>
    %23 = tpu.matmul %21, %22, %cst_18 {dimension_numbers = #tpu.dot_dimension_numbers<[1], [0], [0], [1], [0, 0, 1, 1], [], []>} : vector<8x64xf32>, vector<64x32xf32>, vector<8x32xf32> -> vector<8x32xf32>
    %c0_19 = arith.constant 0 : index
    %c0_20 = arith.constant 0 : index
    %24 = vector.load %arg7[%c0_19, %c0_20] : memref<8x32xf32, #tpu.memory_space<vmem>>, vector<8x32xf32>
    tpu.vector_store %arg7[%c0_19, %c0_20], %23 {strides = array<i32>} : memref<8x32xf32, #tpu.memory_space<vmem>>, vector<8x32xf32>,
    return
  }
  func.func @transform_0(%arg0: i32) -> (i32, i32) {
    %c0_i32 = arith.constant 0 : i32
    %c0_i32_0 = arith.constant 0 : i32
    return %arg0, %c0_i32 : i32, i32
  }
  func.func @transform_1(%arg0: i32) -> (i32, i32) {
    %c0_i32 = arith.constant 0 : i32
    %c0_i32_0 = arith.constant 0 : i32
    return %arg0, %c0_i32 : i32, i32
  }
  func.func @transform_2(%arg0: i32) -> (i32, i32) {
    %c0_i32 = arith.constant 0 : i32
    %c0_i32_0 = arith.constant 0 : i32
    %c0_i32_1 = arith.constant 0 : i32
    return %c0_i32, %c0_i32_0 : i32, i32
  }
  func.func @transform_3(%arg0: i32) -> (i32, i32) {
    %c0_i32 = arith.constant 0 : i32
    %c0_i32_0 = arith.constant 0 : i32
    %c0_i32_1 = arith.constant 0 : i32
    return %c0_i32, %c0_i32_0 : i32, i32
  }
  func.func @transform_4(%arg0: i32) -> (i32, i32) {
    %c0_i32 = arith.constant 0 : i32
    %c0_i32_0 = arith.constant 0 : i32
    %c0_i32_1 = arith.constant 0 : i32
    return %c0_i32, %c0_i32_0 : i32, i32
  }
  func.func @transform_5(%arg0: i32) -> (i32, i32) {
    %c0_i32 = arith.constant 0 : i32
    %c0_i32_0 = arith.constant 0 : i32
    %c0_i32_1 = arith.constant 0 : i32
    return %c0_i32, %c0_i32_0 : i32, i32
  }
  func.func @transform_6(%arg0: i32) -> (i32, i32) {
    %c0_i32 = arith.constant 0 : i32
    %c0_i32_0 = arith.constant 0 : i32
    return %arg0, %c0_i32 : i32, i32
  }
}

</mosaic_0001>

<bundles_post_ra>
// kernel: tpu_custom_call.1
= control target key start
LH: loop header
LB: loop body
LE: loop exit
PB: predicated region body
PF: predicated region fallthrough
CT: control target
= control target key end

     0   :  { %11 = vsyncpa [#allocation3], 0  ;;  %s1300_s0 = inlined_call_operand.vmem [shape: f32[16,32], index: 0, kind: input, shape index: {}]   ;;  %s1301_s1 = inlined_call_operand.vmem [shape: f32[16,32], index: 1, kind: input, shape index: {}]   ;;  %s1302_s2 = inlined_call_operand.vmem [shape: f32[64,64], index: 2, kind: input, shape index: {}]   ;;  %s1303_s3 = inlined_call_operand.hbm [shape: f32[64,64], index: 3, kind: input, shape index: {}]   ;;  %s1304_s4 = inlined_call_operand.vmem [shape: f32[1,64], index: 4, kind: input, shape index: {}]   ;;  %s1305_s5 = inlined_call_operand.vmem [shape: f32[64,32], index: 5, kind: input, shape index: {}]   ;;  %s1306_s6 = inlined_call_operand.hbm [shape: f32[16,32], index: 6, kind: output, shape index: {}]  }
   0x1   :  { %12 = vsyncpa [#allocation4], 0 }
   0x2   :  { %14 = vsyncpa [#allocation4 + $0x1], 0  ;;  %s1083_s21 = smov 0   ;;  %s1085_s22 = smov 0  }
   0x3   :  { %s1087_s23 = smov 0   ;;  %s1089_s24 = smov 0  }
   0x4 LB: > { %s1104_s25 = sadd.s32 4294967295, %s1040_s24   ;;  %s780_s26 = sadd.s32 4294967294, %s1040_s24   ;;  %s1040_s24 = sphi %s1089_s24, %s1314_s24   ;;  %s1036_s23 = sphi %s1087_s23, %s1313_s23   ;;  %s1032_s22 = sphi %s1085_s22, %s1312_s22   ;;  %s1028_s21 = sphi %s1083_s21, %s1311_s21  }
   0x5   : > { %s1108_s27 = sadd.s32 1, %s1040_s24   ;;  %s163_s28 = sadd.s32 1, %s1036_s23 }
   0x6   : > { %s160_s29 = ssub.s32 %s1040_s24, %s1108_s27  ;;  %p173_p0 = scmp.ne.s32.totalorder %s1036_s23, %s1032_s22 }
   0x7   : > { %p161_p1 = scmp.eq.s32.totalorder %s160_s29, 0  ;;  %p174_p2 = scmp.eq.s32.totalorder %s1104_s25, 1 }
   0x8   : > { %p179_p3 = scmp.ne.s32.totalorder %s1032_s22, %s1028_s21  ;;  %p180_p4 = scmp.eq.s32.totalorder %s780_s26, 1 }
   0x9   : > { %s1119_s30 = scalar_select %p161_p1, %s1036_s23, %s163_s28  }
   0xa   : > { %p1121_p5 = por %p174_p2, %p173_p0  ;;  %p1125_p6 = por %p180_p4, %p179_p3 }
   0xb   : > { %p781_p7 = scmp.ge.s32.totalorder %s1040_s24, 1  ;;  %p187_p8 = scmp.lt.s32.totalorder %s1040_s24, 3 }
   0xc   : > { %s1308_s8 = scalar_select %p1125_p6, 1, 0 }
   0xd   : > { %p906_p9 = scmp.eq.s32.totalorder %s1104_s25, 0  ;;  %p1132_p10 = pnand %p781_p7, %p187_p8 }
   0xe   : > { %s1042_s10 = smov [#allocation2]  }
   0xf   : > { %s202_s11 = sshll.u32 %s1042_s10, 4  ;;  %p898_p11 = pneg %p1132_p10  ;;  %s203_s11 = int_to_ptr.vmem [resolvable:$true] %s202_s11 }
  0x10   : > { %s961_s12 = scalar_lea.vmem %s203_s11, 1024  ;;  %p969_p3 = scmp.lt.s32.totalorder %s203_s11, %s203_s11 }
  0x11   : > { %p899_p12 = pnand %p906_p9, %p898_p11  ;;  %p962_p0 = scmp.ne.s32.totalorder %s203_s11, %s961_s12 }
  0x12   : > { %p970_p4 = scmp.lt.s32.totalorder %s961_s12, %s961_s12 }
  0x13   : > { %p952_p13 = pneg %p899_p12 }
  0x14   : > { %p971_p6 = por %p970_p4, %p969_p3 }
  0x15   : > { %p964_p1 = pnand %p962_p0, %p952_p13 }
  0x17   : > { %p965_p2 = pneg %p964_p1 }
  0x19   : > { %p972_p7 = pnand %p971_p6, %p965_p2 }
  0x1b   : > { %975 = shalt.err (!%p972_p7)
}
  0x1c   : > { %s1043_s13 = smov 128   ;;  %s1044_s14 = smov 8  }
  0x1d   : > { %901 = dma.hbm_to_vmem [thread:$0]  (!%p899_p12), %s1303_s3, 1024, %s203_s11, [#allocation3], %s1043_s13, %s1043_s13, %s1044_s14  }
  0x1e   : > { %238 = sbr.rel (%p1132_p10) target bundleno = 494 (0x1ee), region = 44 }
  0x23   : > { %1019 = dma.done.wait (%p906_p9), [#allocation3], 1024  }
  0x24   : > { %1021 = vsyncadd (%p906_p9), [#allocation3], 4294966272  ;;  %p271_p8 = scmp.lt.s32.totalorder %s1104_s25, 1  ;;  %v1045_v0 = vmov 0.0   ;;  %vm1046_vm0 = vmmov 0   ;;  %v288_v1 = vld [vmem:[%s1302_s2 + $0x38] sm:$0xff] }
  0x25   : > { %829 = vmatprep.subr.mxu1 %v1045_v0  ;;  %837 = vmatprep.mubr.msk.f32.mxu1 %vm1046_vm0, %v1045_v0  ;;  %v287_v2 = vld [vmem:[%s1302_s2 + $0x30] sm:$0xff]  ;;  %v286_v3 = vld [vmem:[%s1302_s2 + $0x28] sm:$0xff]  ;;  %v451_v4 = vld [vmem:[#allocation2 + $0x38] sm:$0xff]  ;;  %vm289_vm1 = vcmask 261120   ;;  %vm608_vm2 = vcmask 523264   ;;  %s268_s14 = sand.u32 1, %s1032_s22  }
  0x26   : > { %s1154_s17 = scalar_select %p271_p8, %s1104_s25, 1  ;;  %851 = vmatprep.subr.mxu0 %v1045_v0  ;;  %859 = vmatprep.mubr.msk.f32.mxu0 %vm1046_vm0, %v1045_v0  ;;  %v285_v5 = vld [vmem:[%s1302_s2 + $0x20] sm:$0xff]  ;;  %v450_v6 = vld [vmem:[#allocation2 + $0x30] sm:$0xff]  ;;  %v284_v8 = vld [vmem:[%s1302_s2 + $0x18] sm:$0xff] }
  0x27   : > { %830 = vmatpush3.msra.mxu1 %v288_v1  ;;  %852 = vmatpush3.msra.mxu0 %v451_v4  ;;  %v449_v9 = vld [vmem:[#allocation2 + $0x28] sm:$0xff]  ;;  %v283_v10 = vld [vmem:[%s1302_s2 + $0x10] sm:$0xff]  ;;  %v448_v11 = vld [vmem:[#allocation2 + $0x20] sm:$0xff]  ;;  %s786_s15 = sshll.u32 %s268_s14, 3  ;;  %s797_s16 = sshll.u32 %s1104_s25, 7 }
  0x28   : > { %s787_s18 = sshll.u32 %s1154_s17, 3  ;;  %831 = vmatprep.subr.mxu1 %v1045_v0  ;;  %853 = vmatprep.subr.mxu0 %v1045_v0  ;;  %v282_v12 = vld [vmem:[%s1302_s2 + $0x8] sm:$0xff]  ;;  %v281_v13 = vld [vmem:[%s1302_s2] sm:$0xff]  ;;  %v447_v15 = vld [vmem:[#allocation2 + $0x18] sm:$0xff]  ;;  %s270_s19 = scalar_lea.vmem [#allocation5], %s786_s15 }
  0x29   : > { %s278_s12 = scalar_lea.vmem %s1301_s1, %s787_s18  ;;  %832 = vmatpush3.msra.mxu1 %v287_v2  ;;  %854 = vmatpush3.msra.mxu0 %v450_v6  ;;  %s274_s29 = scalar_lea.vmem %s1300_s0, %s787_s18  ;;  %v446_v16 = vld [vmem:[#allocation2 + $0x10] sm:$0xff]  ;;  %v445_v17 = vld [vmem:[#allocation2 + $0x8] sm:$0xff]  ;;  %v444_v18 = vld [vmem:[#allocation2] sm:$0xff] }
  0x2a   : > { %833 = vmatprep.subr.mxu1 %v1045_v0  ;;  %v280_v7 = vld [vmem:[%s278_s12] sm:$0xff]  ;;  %855 = vmatprep.subr.mxu0 %v1045_v0  ;;  %v607_v19 = vld [vmem:[%s1305_s5 + $0x38] sm:$0xff]  ;;  %v606_v20 = vld [vmem:[%s1305_s5 + $0x30] sm:$0xff]  ;;  %s697_s20 = sshll.u32 %s270_s19, 4  ;;  %s684_s9 = scalar_lea.sflag [#allocation4], %s268_s14  ;;  %s1260_s20 = int_to_ptr.vmem [resolvable:$true] %s697_s20 }
  0x2b   : > { %834 = vmatpush3.msra.mxu1 %v286_v3  ;;  %856 = vmatpush3.msra.mxu0 %v449_v9  ;;  %v279_v14 = vld [vmem:[%s274_s29] sm:$0xff]  ;;  %v605_v21 = vld [vmem:[%s1305_s5 + $0x28] sm:$0xff]  ;;  %v603_v23 = vld [vmem:[%s1305_s5 + $0x18] sm:$0xff]  ;;  %s1258_s29 = scalar_lea.hbm %s1306_s6, %s797_s16  ;;  %s976_s10 = scalar_lea.vmem %s1260_s20, 128 }
  0x2c   : > { %835 = vmatprep.subr.mxu1 %v1045_v0  ;;  %857 = vmatprep.subr.mxu0 %v1045_v0  ;;  %v604_v22 = vld [vmem:[%s1305_s5 + $0x20] sm:$0xff]  ;;  %v602_v24 = vld [vmem:[%s1305_s5 + $0x10] sm:$0xff]  ;;  %v601_v25 = vld [vmem:[%s1305_s5 + $0x8] sm:$0xff]  ;;  %p977_p6 = scmp.ne.s32.totalorder %s1260_s20, %s976_s10  ;;  %s1047_s25 = smov [#allocation5]  }
  0x2d   : > { %836 = vmatpush3.msra.mxu1 %v285_v5  ;;  %858 = vmatpush3.msra.mxu0 %v448_v11  ;;  %v600_v26 = vld [vmem:[%s1305_s5] sm:$0xff]  ;;  %s980_s11 = sshll.u32 %s1047_s25, 4  ;;  %s981_s11 = int_to_ptr.vmem [resolvable:$false] %s980_s11 }
  0x2e   : > { %838 = vmatmul.mubr.msk.f32.vlgmr.msra.gmra.mxu1 %vm289_vm1, %v280_v7  ;;  %840 = vmatprep.subr.mxu1 %v1045_v0  ;;  %v791_v32 = vld [vmem:[%s1304_s4] ss:$0 sm:$0xff]  ;;  %p978_p9 = pnand %p977_p6, %p1121_p5  ;;  %s982_s12 = scalar_lea.vmem %s981_s11, 256 }
  0x2f   : > { %841 = vmatpush3.msra.mxu1 %v284_v8  ;;  %848 = vmatprep.mubr.msk.f32.mxu1 %vm1046_vm0, %v1045_v0  ;;  %p983_p11 = scmp.lt.s32.totalorder %s1260_s20, %s981_s11  ;;  %p984_p12 = scmp.lt.s32.totalorder %s982_s12, %s976_s10 }
  0x30   : > { %842 = vmatprep.subr.mxu1 %v1045_v0  ;;  %860 = vmatmul.mubr.msk.f32.vlgmr.msra.gmra.mxu0 %vm289_vm1, %v280_v7  ;;  %p979_p10 = pneg %p978_p9 }
  0x31   : > { %843 = vmatpush3.msra.mxu1 %v283_v10  ;;  %873 = vmatprep.subr.mxu0 %v1045_v0  ;;  %p985_p13 = por %p984_p12, %p983_p11 }
  0x32   : > { %844 = vmatprep.subr.mxu1 %v1045_v0  ;;  %889 = vmatprep.mubr.msk.f32.mxu0 %vm1046_vm0, %v1045_v0 }
  0x33   : > { %845 = vmatpush3.msra.mxu1 %v282_v12  ;;  %874 = vmatpush3.msra.mxu0 %v607_v19  ;;  %p986_p0 = pnand %p985_p13, %p979_p10 }
  0x34   : > { %846 = vmatprep.subr.mxu1 %v1045_v0  ;;  %875 = vmatprep.subr.mxu0 %v1045_v0 }
  0x35   : > { %847 = vmatpush3.msra.mxu1 %v281_v13  ;;  %876 = vmatpush3.msra.mxu0 %v606_v20 }
  0x36   : > { %849 = vmatmul.mubr.msk.f32.vlgmr.msra.gmra.mxu1 %vm289_vm1, %v279_v14  ;;  %862 = vmatprep.subr.mxu1 %v1045_v0 }
  0x37   : > { %863 = vmatpush3.msra.mxu1 %v447_v15  ;;  %870 = vmatprep.mubr.msk.f32.mxu1 %vm1046_vm0, %v1045_v0 }
  0x38   : > { %864 = vmatprep.subr.mxu1 %v1045_v0  ;;  %877 = vmatprep.subr.mxu0 %v1045_v0 }
  0x39   : > { %865 = vmatpush3.msra.mxu1 %v446_v16  ;;  %878 = vmatpush3.msra.mxu0 %v605_v21 }
  0x3a   : > { %866 = vmatprep.subr.mxu1 %v1045_v0  ;;  %879 = vmatprep.subr.mxu0 %v1045_v0 }
  0x3b   : > { %867 = vmatpush3.msra.mxu1 %v445_v17  ;;  %880 = vmatpush3.msra.mxu0 %v604_v22 }
  0x3c   : > { %868 = vmatprep.subr.mxu1 %v1045_v0  ;;  %881 = vmatprep.subr.mxu0 %v1045_v0 }
  0x3d   : > { %869 = vmatpush3.msra.mxu1 %v444_v18  ;;  %882 = vmatpush3.msra.mxu0 %v603_v23 }
  0x3e   : > { %871 = vmatmul.mubr.msk.f32.vlgmr.msra.gmra.mxu1 %vm289_vm1, %v279_v14  ;;  %883 = vmatprep.subr.mxu0 %v1045_v0 }
  0x3f   : > { %884 = vmatpush3.msra.mxu0 %v602_v24 }
  0x40   : > { %885 = vmatprep.subr.mxu0 %v1045_v0 }
  0x41   : > { %886 = vmatpush3.msra.mxu0 %v601_v25 }
  0x42   : > { %887 = vmatprep.subr.mxu0 %v1045_v0 }
  0x43   : > { %888 = vmatpush3.msra.mxu0 %v600_v26 }
  0xee   : > { %v359_v27 = vpop.f32.mrf.mxu1 }
  0xf0   : > { %v839_v28 = vpop.f32.mrf.mxu1  ;;  %v518_v29 = vpop.f32.mrf.mxu0 }
  0xf2   : > { %v861_v30 = vpop.f32.mrf.mxu0 }
  0xf6   : > { %v432_v31 = vpop.f32.mrf.mxu1 }
  0xf7   : > { %v433_v33 = vadd.f32 %v432_v31, %v359_v27 }
  0xf8   : > { %v850_v34 = vpop.f32.mrf.mxu1 }
  0xf9   : > { %v443_v35 = vadd.f32 %v791_v32, %v433_v33 }
  0xfb   : > { %v794_v36 = vmul.f32 -1.442695, %v443_v35 }
  0xfd   : > { %946 = vpow2.f32 %v794_v36 }
  0xfe   : > { %v588_v37 = vpop.f32.mrf.mxu1 }
  0xff   : > { %v589_v41 = vadd.f32 %v588_v37, %v518_v29 }
 0x100   : > { %v872_v38 = vpop.f32.mrf.mxu1 }
 0x10a   : > { %v947_v39 = vpop.eup %946 }
 0x10b   : > { %v595_v40 = vadd.f32 1.0, %v947_v39 }
 0x10d   : > { %948 = vrcp.f32 %v595_v40 }
 0x11a   : > { %v949_v42 = vpop.eup %948 }
 0x11b   : > { %v598_v43 = vmul.f32 %v949_v42, %v443_v35 }
 0x11d   : > { %v599_v44 = vmul.f32 %v598_v43, %v589_v41 }
 0x11f   : > { %890 = vmatmul.mubr.msk.f32.vlgmr.msra.gmra.mxu0 %vm608_vm2, %v599_v44 }
 0x1df   : > { %v678_v45 = vpop.f32.mrf.mxu0 }
 0x1e0   : > { %682 = vst.msk [vmem:[%s270_s19] sm:$0xff] %vm289_vm1, %v678_v45 }
 0x1e1   : > { %v891_v46 = vpop.f32.mrf.mxu0 }
 0x1e2   : > { %989 = shalt.err (!%p986_p0)
}
 0x1e3   : > { %s990_s17 = scalar_lea.hbm %s1258_s29, 128  ;;  %s994_s14 = scalar_lea.hbm %s1306_s6, 256 }
 0x1e4   : > { %p991_p1 = scmp.ne.s32.totalorder %s1258_s29, %s990_s17  ;;  %p995_p4 = scmp.lt.s32.totalorder %s1258_s29, %s1306_s6 }
 0x1e5   : > { %p996_p7 = scmp.lt.s32.totalorder %s994_s14, %s990_s17 }
 0x1e6   : > { %p992_p2 = pnand %p991_p1, %p1121_p5 }
 0x1e7   : > { %p997_p8 = por %p996_p7, %p995_p4 }
 0x1e8   : > { %p993_p3 = pneg %p992_p2 }
 0x1ea   : > { %p998_p6 = pnand %p997_p8, %p993_p3 }
 0x1ec   : > { %1001 = shalt.err (!%p998_p6)
}
 0x1ed   : > { %896 = dma.vmem_to_hbm [thread:$0]  (%p1121_p5), %s1260_s20, 128, %s1258_s29, %s684_s9  }
 0x1ee PF: > { %p908_p9 = scmp.ge.s32.totalorder %s1040_s24, 2  ;;  %s709_s19 = sand.u32 1, %s1028_s21  }
 0x1ef   : > { %p1310_p10 = scmp.ne.s32.totalorder %s1308_s8, 0  ;;  %s710_s26 = scalar_lea.sflag [#allocation4], %s709_s19 }
 0x1f1   : > { %p903_p11 = pnand %p908_p9, %p1310_p10 }
 0x1f3   : > { %p904_p12 = pneg %p903_p11 }
 0x1f5   : > { %1023 = dma.done.wait (%p904_p12), %s710_s26, 128  }
 0x1f6   : > { %1025 = vsyncadd (%p904_p12), %s710_s26, 4294967168  ;;  %p17_p13 = scmp.ge.s32.totalorder %s1108_s27, 4   ;;  %s1311_s21 = smov %s1032_s22 }
 0x1f7   : > { %s1312_s22 = smov %s1036_s23  ;;  %s1313_s23 = smov %s1119_s30 }
 0x1f8   : > { %s1314_s24 = smov %s1108_s27  ;;  %19 = sbr.rel (!%p17_p13) target bundleno = 4 (0x4), region = 87 }
 0x1fd   :  { %715 = vsyncpa [#allocation3], 1 }
 0x1fe   :  { %717 = vsyncpa [#allocation3 + $0x1], 1 }
 0x1ff   :  { %718 = vsyncpa [#allocation4], 1 }
 0x200   :  { %720 = vsyncpa [#allocation4 + $0x1], 1 }

</bundles_post_ra>
